<compile_context>
chip_gen: v7x
topology: tpu7x:2x2x1
jax: 0.10.0
libtpu: 0.0.40
codegen_flags: <defaults>
</compile_context>

<pallas_src>
import functools

import jax
import jax.numpy as jnp
from jax.experimental import pallas as pl
from jax.experimental.pallas import tpu as pltpu


_MAX_FEATURE_TILE = 8192     # absolute lane cap -> at most 64 unrolled 128-lane groups


# --------------------------- hardware-aware sizing ---------------------------


@functools.lru_cache(maxsize=None)
def _hw_budgets():
    """(vmem_limit_bytes, per_stream_block_bytes, max_batch_tile) per TPU generation."""
    cap = 64 << 20
    try:
        info = pltpu.get_tpu_info()
        c = getattr(info, "vmem_capacity_bytes", None)
        if c:
            cap = int(c)
    except Exception:
        pass
    if cap >= (128 << 20):                       # v5e / v6e: 128 MiB physical VMEM
        return (64 << 20, 4 << 20, 256)
    # v7x (64 MiB physical VMEM) or unknown: stay conservative
    return (40 << 20, 2 << 20, 128)


def _pick_batch_tile(b, max_tb):
    if b <= max_tb:
        return b
    if b % 8 != 0:
        # Full-extent batch block is the only legal option without row padding;
        # the feature tile is shrunk below to respect the VMEM budget.
        return b
    tb = max_tb - (max_tb % 8)
    while tb >= 8 and b % tb != 0:
        tb -= 8
    return tb if tb >= 8 else b


def _pick_feature_tile(f_padded, tb, itemsize, max_block_bytes, max_tf=_MAX_FEATURE_TILE):
    """Largest multiple of 128 dividing f_padded with tb*tf*itemsize <= max_block_bytes."""
    cap = (max_block_bytes // max(tb * itemsize, 1)) // 128 * 128
    cap = max(cap, 128)
    tf = min(f_padded, cap, max_tf)
    tf -= tf % 128
    tf = max(tf, 128)
    while f_padded % tf:                          # f_padded is a multiple of 128
        tf -= 128
    return tf


def _pad_features(x2d):
    """Zero-pad the feature (last) axis to a multiple of 128."""
    f = x2d.shape[1]
    pad = (-f) % 128
    if pad:
        x2d = jnp.pad(x2d, ((0, 0), (0, pad)))
    return x2d, f, f + pad


# ----------------------------- kernels ---------------------------------------


def _gen_loss_kernel(fake_ref, out_ref):
    # -mean(fake_logits)
    out_ref[0, 0] = -jnp.mean(fake_ref[...].astype(jnp.float32))


def _disc_loss_kernel(real_ref, fake_ref, out_ref):
    # -mean(real_logits) + mean(fake_logits)
    out_ref[0, 0] = (-jnp.mean(real_ref[...].astype(jnp.float32))
                     + jnp.mean(fake_ref[...].astype(jnp.float32)))


def _interp_kernel(alpha_ref, real_ref, fake_ref, out_ref):
    # out = fake + alpha * (real - fake)  (== alpha*real + (1-alpha)*fake)
    a = alpha_ref[...]                       # (TB, 1) broadcasts over the feature tile
    f = fake_ref[...]
    out_ref[...] = f + a * (real_ref[...] - f)


def _grad_sumsq_kernel(grad_ref, sumsq_ref, lanes_ref, *, n_lane_groups):
    # Grid = (batch blocks ["parallel"], feature blocks ["arbitrary", last]).
    # lanes_ref: (tb, 128) f32 resident lane-partial accumulator.
    k = pl.program_id(1)

    @pl.when(k == 0)
    def _init():
        lanes_ref[...] = jnp.zeros_like(lanes_ref)

    # Pure VPU mul/add on aligned 128-lane slices; no per-tile XLU reduce,
    # no masked (tb,1) store in the steady state. Cast to f32 per slice.
    acc = lanes_ref[...]
    for j in range(n_lane_groups):
        g = grad_ref[:, j * 128:(j + 1) * 128].astype(jnp.float32)
        acc = acc + g * g
    lanes_ref[...] = acc

    @pl.when(k == pl.num_programs(1) - 1)
    def _finalize():
        # Single cross-lane reduce per batch block.
        sumsq_ref[...] = jnp.sum(lanes_ref[...], axis=1, keepdims=True)


# ----------------------------- pallas wrappers --------------------------------


def _scalar_pallas(kernel, *arrays):
    """Whole-array scalar reduction (tiny (B,1) logits). Only used when a kernel
    is strictly required; the default module path uses plain jnp (perf review)."""
    out = pl.pallas_call(
        kernel,
        out_shape=jax.ShapeDtypeStruct((1, 1), jnp.float32),
        out_specs=pl.BlockSpec(memory_space=pltpu.MemorySpace.SMEM),
    )(*arrays)
    return out[0, 0]


def _interpolates_pallas(alpha, reals_f, fakes_f, *, max_block_bytes=None, max_tb=None):
    b, f = reals_f.shape
    itemsize = jnp.dtype(reals_f.dtype).itemsize
    vmem_limit, blk_bytes, tb_cap = _hw_budgets()
    if max_block_bytes is not None:
        blk_bytes = max_block_bytes
    if max_tb is not None:
        tb_cap = max_tb

    reals_p, _, fp = _pad_features(reals_f)
    fakes_p, _, _ = _pad_features(fakes_f)

    tb = _pick_batch_tile(b, tb_cap)
    tf = _pick_feature_tile(fp, tb, itemsize, blk_bytes)

    out = pl.pallas_call(
        _interp_kernel,
        out_shape=jax.ShapeDtypeStruct((b, fp), reals_f.dtype),
        grid_spec=pltpu.PrefetchScalarGridSpec(
            num_scalar_prefetch=0,
            grid=(b // tb, fp // tf),
            in_specs=[pl.BlockSpec((tb, 1), lambda i, j: (i, 0)),
                      pl.BlockSpec((tb, tf), lambda i, j: (i, j)),
                      pl.BlockSpec((tb, tf), lambda i, j: (i, j))],
            out_specs=pl.BlockSpec((tb, tf), lambda i, j: (i, j))),
        compiler_params=pltpu.CompilerParams(
            dimension_semantics=("parallel", "parallel"),
            vmem_limit_bytes=vmem_limit),
        cost_estimate=pl.CostEstimate(
            flops=3 * b * fp,
            transcendentals=0,
            bytes_accessed=(3 * b * fp + b) * itemsize),
    )(alpha, reals_p, fakes_p)
    return out[:, :f] if fp != f else out


def _grad_penalty_sumsq_pallas(grads_f, *, max_block_bytes=None, max_tb=None):
    """Streaming per-row sum-of-squares of the (B, F) gradients -> (B, 1) f32."""
    b, _ = grads_f.shape
    itemsize = jnp.dtype(grads_f.dtype).itemsize
    vmem_limit, blk_bytes, tb_cap = _hw_budgets()
    blk_bytes = 2 * blk_bytes if max_block_bytes is None else max_block_bytes  # single stream
    if max_tb is not None:
        tb_cap = max_tb

    grads_p, _, fp = _pad_features(grads_f)     # zero pad -> no effect on sum of squares

    tb = _pick_batch_tile(b, tb_cap)
    tf = _pick_feature_tile(fp, tb, itemsize, blk_bytes)
    kernel = functools.partial(_grad_sumsq_kernel, n_lane_groups=tf // 128)

    sumsq = pl.pallas_call(
        kernel,
        out_shape=jax.ShapeDtypeStruct((b, 1), jnp.float32),
        grid_spec=pltpu.PrefetchScalarGridSpec(
            num_scalar_prefetch=0,
            grid=(b // tb, fp // tf),
            in_specs=[pl.BlockSpec((tb, tf), lambda i, k: (i, k))],
            out_specs=pl.BlockSpec((tb, 1), lambda i, k: (i, 0)),
            scratch_shapes=[pltpu.VMEM((tb, 128), jnp.float32)]),
        compiler_params=pltpu.CompilerParams(
            dimension_semantics=("parallel", "arbitrary"),
            vmem_limit_bytes=vmem_limit),
        cost_estimate=pl.CostEstimate(
            flops=2 * b * fp,
            transcendentals=0,
            bytes_accessed=b * fp * itemsize + b * 4),
    )(grads_p)
    return sumsq


# custom VJP so the penalty can be differentiated (grad-of-grad WGAN-GP path).
def _gradient_penalty_impl(grads_f, lambda_gp):
    b = grads_f.shape[0]
    sumsq = _grad_penalty_sumsq_pallas(grads_f)            # hot path: Pallas streaming reduce
    norms = jnp.sqrt(sumsq)                                # tiny (B,1) finalize in XLA
    gp = jnp.sum((norms - 1.0) ** 2) * (float(lambda_gp) / b)
    return gp, sumsq


@functools.partial(jax.custom_vjp, nondiff_argnums=(1,))
def _gradient_penalty(grads_f, lambda_gp):
    gp, _ = _gradient_penalty_impl(grads_f, lambda_gp)
    return gp


def _gradient_penalty_fwd(grads_f, lambda_gp):
    gp, sumsq = _gradient_penalty_impl(grads_f, lambda_gp)
    return gp, (grads_f, sumsq)


def _gradient_penalty_bwd(lambda_gp, res, ct):
    grads_f, sumsq = res
    b = grads_f.shape[0]
    norms = jnp.sqrt(jnp.maximum(sumsq, 1e-12))                     # eps guard at ||g|| ~ 0
    scale = (2.0 * float(lambda_gp) / b) * (norms - 1.0) / norms    # (B, 1)
    dg = (ct * scale) * grads_f.astype(jnp.float32)
    return (dg.astype(grads_f.dtype),)


_gradient_penalty.defvjp(_gradient_penalty_fwd, _gradient_penalty_bwd)


# ----------------------------- module wrapper ---------------------------------


class WassersteinGPLoss:
    def __init__(self, lambda_gp=10, reduction='mean', use_pallas_scalar_losses=False):
        assert reduction in ('sum', 'mean')
        self.reduction = reduction            # kept for parity; unused in forward (as in PyTorch)
        self.lambda_gp = float(lambda_gp)
        self.use_pallas_scalar_losses = use_pallas_scalar_losses

    def __call__(self, fake_logits, mode, real_logits=None):
        assert mode in ('generator', 'discriminator')
        if self.use_pallas_scalar_losses:
            if mode == 'generator':
                return _scalar_pallas(_gen_loss_kernel, fake_logits)
            return _scalar_pallas(_disc_loss_kernel, real_logits, fake_logits)
        # Perf review: (B,1) logits are a few hundred bytes; the pallas_call fixed
        # cost (~1-2 us + DMA + HBM round trip) dwarfs the compute, so fold the
        # means into the surrounding XLA graph.
        if mode == 'generator':
            return -jnp.mean(fake_logits)
        return -jnp.mean(real_logits) + jnp.mean(fake_logits)

    def get_interpolates(self, reals, fakes, key):
        # torch.rand(B,1,1,1).expand_as(reals) -> per-sample alpha broadcast over features
        b = reals.shape[0]
        alpha = jax.random.uniform(key, (b, 1), dtype=reals.dtype)
        out = _interpolates_pallas(alpha, reals.reshape(b, -1), fakes.reshape(b, -1))
        return out.reshape(reals.shape)

    def grad_penalty_loss(self, interpolates, disc_fn):
        # TODO(synk): torch.autograd.grad over an existing graph has no in-kernel
        # equivalent; gradients come from jax.grad (grad_outputs=ones == grad of
        # sum(logits)), and the norm/penalty reduction (the hot path) runs in Pallas.
        grads = jax.grad(lambda x: jnp.sum(disc_fn(x)))(interpolates)
        b = grads.shape[0]
        grads_f = grads.reshape(b, -1)        # native dtype; cast to f32 per slice in-kernel
        return _gradient_penalty(grads_f, self.lambda_gp)


# ----------------------------- main --------------------------------------------


if __name__ == "__main__":
    key = jax.random.PRNGKey(0)
    k1, k2, k3, k4, k5, k6, k7, k8 = jax.random.split(key, 8)

    B, C, H, W = 8, 4, 16, 16            # F = 1024
    F = C * H * W

    fake_logits = jax.random.normal(k1, (B, 1), dtype=jnp.float32)
    real_logits = jax.random.normal(k2, (B, 1), dtype=jnp.float32)
    reals = jax.random.normal(k3, (B, C, H, W), dtype=jnp.float32)
    fakes = jax.random.normal(k4, (B, C, H, W), dtype=jnp.float32)

    loss_fn = WassersteinGPLoss(lambda_gp=10, reduction='mean')
    loss_fn_k = WassersteinGPLoss(lambda_gp=10, reduction='mean',
                                  use_pallas_scalar_losses=True)

    # forward (default XLA path + explicit Pallas-kernel path)
    g_loss = loss_fn(fake_logits, 'generator')
    d_loss = loss_fn(fake_logits, 'discriminator', real_logits=real_logits)
    g_loss_k = loss_fn_k(fake_logits, 'generator')
    d_loss_k = loss_fn_k(fake_logits, 'discriminator', real_logits=real_logits)

    # interpolates (default tiling)
    interp = loss_fn.get_interpolates(reals, fakes, k5)

    # gradient penalty with a tiny deterministic tanh discriminator
    w1 = jax.random.normal(k6, (F, 32), jnp.float32) * 0.02
    w2 = jax.random.normal(k7, (32, 1), jnp.float32) * 0.1

    def disc_fn(x):
        return jnp.tanh(x.reshape(x.shape[0], -1) @ w1) @ w2

    gp = loss_fn.grad_penalty_loss(interp, disc_fn)
    gp_grad = jax.grad(lambda x: loss_fn.grad_penalty_loss(x, disc_fn))(interp)

    # extra coverage: forced multi-feature-tile streaming path + odd-F padding path
    grads_demo = jax.random.normal(k8, (B, F), dtype=jnp.float32)
    sumsq_multi = _grad_penalty_sumsq_pallas(grads_demo, max_block_bytes=B * 256 * 4)
    grads_odd = jax.random.normal(k8, (B, 200), dtype=jnp.float32)
    sumsq_odd = _grad_penalty_sumsq_pallas(grads_odd)
    alpha_t = jax.random.uniform(k5, (B, 1), dtype=jnp.float32)
    interp_tiled = _interpolates_pallas(alpha_t, reals.reshape(B, -1), fakes.reshape(B, -1),
                                        max_block_bytes=B * 256 * 4)

    jax.block_until_ready((g_loss, d_loss, g_loss_k, d_loss_k, interp, gp, gp_grad,
                           sumsq_multi, sumsq_odd, interp_tiled))

    # ---- references (plain JAX) ------------------------------------------------
    g_ref = -jnp.mean(fake_logits)
    d_ref = -jnp.mean(real_logits) + jnp.mean(fake_logits)

    alpha_ref = jax.random.uniform(k5, (B, 1), dtype=reals.dtype).reshape(B, 1, 1, 1)
    interp_ref = alpha_ref * reals + (1.0 - alpha_ref) * fakes

    def gp_ref_fn(x):
        g = jax.grad(lambda y: jnp.sum(disc_fn(y)))(x).reshape(B, -1)
        return jnp.mean((jnp.linalg.norm(g, axis=1) - 1.0) ** 2) * 10.0

    gp_ref = gp_ref_fn(interp)
    gp_grad_ref = jax.grad(gp_ref_fn)(interp)

    assert jnp.allclose(g_loss, g_ref, atol=1e-5), (g_loss, g_ref)
    assert jnp.allclose(d_loss, d_ref, atol=1e-5), (d_loss, d_ref)
    assert jnp.allclose(g_loss_k, g_ref, atol=1e-5), (g_loss_k, g_ref)
    assert jnp.allclose(d_loss_k, d_ref, atol=1e-5), (d_loss_k, d_ref)
    assert jnp.allclose(interp, interp_ref, atol=1e-5), "interpolates mismatch"
    assert jnp.allclose(gp, gp_ref, atol=1e-4, rtol=1e-4), (gp, gp_ref)
    assert jnp.allclose(gp_grad, gp_grad_ref, atol=1e-5, rtol=1e-3), "gp grad mismatch"
    assert jnp.allclose(sumsq_multi, jnp.sum(grads_demo ** 2, axis=1, keepdims=True),
                        atol=1e-3, rtol=1e-5), "multi-tile sumsq mismatch"
    assert jnp.allclose(sumsq_odd, jnp.sum(grads_odd ** 2, axis=1, keepdims=True),
                        atol=1e-3, rtol=1e-5), "padded sumsq mismatch"
    assert jnp.allclose(interp_tiled,
                        alpha_t * reals.reshape(B, -1) + (1 - alpha_t) * fakes.reshape(B, -1),
                        atol=1e-5), "tiled interpolates mismatch"

    print("KERNEL_OK")
</pallas_src>

<mosaic_0001>
module attributes {stable_mosaic.version = 11 : i64} {
  func.func @_gen_loss_kernel(%arg0: memref<8x1xf32, #tpu.memory_space<vmem>>, %arg1: memref<1x1xf32, #tpu.memory_space<smem>>) attributes {dimension_semantics = [], scalar_prefetch = 0 : i64, scratch_operands = 0 : i64, tpu.core_type = #tpu.core_type<tc>} {
    %c0 = arith.constant 0 : index
    %c0_0 = arith.constant 0 : index
    %0 = vector.load %arg0[%c0, %c0_0] : memref<8x1xf32, #tpu.memory_space<vmem>>, vector<8x1xf32>
    %1 = vector.shape_cast %0 : vector<8x1xf32> to vector<1x8x1xf32>
    %cst = arith.constant dense<0.000000e+00> : vector<1xf32>
    %2 = vector.multi_reduction <add>, %1, %cst [1, 2] : vector<1x8x1xf32> to vector<1xf32>
    %3 = vector.shape_cast %2 : vector<1xf32> to vector<1x1x1xf32>
    %4 = vector.extract %3[0, 0, 0] : f32 from vector<1x1x1xf32>
    %cst_1 = arith.constant 8.000000e+00 : f32
    %5 = arith.divf %4, %cst_1 : f32
    %cst_2 = arith.constant 0.000000e+00 : f32
    %6 = arith.subf %cst_2, %5 : f32
    %c0_3 = arith.constant 0 : index
    %c0_4 = arith.constant 0 : index
    %7 = memref.load %arg1[%c0_3, %c0_4] : memref<1x1xf32, #tpu.memory_space<smem>>
    memref.store %6, %arg1[%c0_3, %c0_4] : memref<1x1xf32, #tpu.memory_space<smem>>
    return
  }
}

</mosaic_0001>

<bundles_post_ra>
// kernel: tpu_custom_call.1
= control target key start
LH: loop header
LB: loop body
LE: loop exit
PB: predicated region body
PF: predicated region fallthrough
CT: control target
= control target key end

     0   :  { %vm10_vm0 = vcmask 7168   ;;  %s81_s0 = inlined_call_operand.vmem [shape: f32[8,1], index: 0, kind: input, shape index: {}]   ;;  %s82_s1 = inlined_call_operand.hbm [shape: f32[1,1], index: 1, kind: output, shape index: {}]  }
   0x1   :  { %v9_v0 = vld [vmem:[%s81_s0] sm:$0xff] }
   0x2   :  { %6 = vsyncpa [#allocation3], 0  ;;  %v11_v1 = vsel %vm10_vm0, %v9_v0, 0.0  ;;  %s43_s0 = scalar_lea.hbm %s82_s1, 16 }
   0x3   :  { %12 = vadd.xlane.f32.xlu0 %v11_v1  ;;  %p44_p0 = scmp.ne.s32.totalorder %s82_s1, %s43_s0  ;;  %p47_p1 = scmp.lt.u32.totalorder %s43_s0, %s82_s1 }
   0x5   :  { %p49_p2 = pnand %p47_p1, %p44_p0 }
  0x90   :  { %v13_v2 = vpop.xlane.xlu0 %12 }
  0x91   :  { %v14_v3 = vrot.slane %v13_v2, 4 }
  0x93   :  { %v15_v4 = vadd.f32 %v14_v3, %v13_v2 }
  0x95   :  { %v16_v5 = vrot.slane %v15_v4, 2 }
  0x97   :  { %v17_v6 = vadd.f32 %v16_v5, %v15_v4 }
  0x99   :  { %v18_v7 = vrot.slane %v17_v6, 1 }
  0x9b   :  { %v19_v8 = vadd.f32 %v18_v7, %v17_v6 }
  0x9d   :  { %40 = vpush %v19_v8 }
  0xce   :  { %s41_s8 = spop %40 }
  0xcf   :  { %s23_s9 = smul.f32 0.125, %s41_s8 }
  0xd1   :  { %s24_s10 = ssub.f32 0.0, %s23_s9 }
  0xd3   :  { %26 = sst [smem:[#allocation2]] %s24_s10 }
  0xd4   :  { %52 = shalt.err (!%p49_p2)
}
  0xd5   :  { %s55_s17 = smov [#allocation2]  }
  0xd6   :  { %34 = dma.smem_to_hbm %s55_s17, 16, %s82_s1, [#allocation3]  }
  0xd7   :  { %53 = dma.done.wait [#allocation3], 16  }
  0xd8   :  { %54 = vsyncadd [#allocation3], 4294967280 }
  0xd9   :  { %38 = sfence }
  0xda   :  { %39 = vsyncpa [#allocation3], 1 }

</bundles_post_ra>
